<compile_context>
chip_gen: v6e
topology: v6e:2x2x1
jax: 0.10.0
libtpu: 0.0.40
codegen_flags: <defaults>
</compile_context>

<pallas_src>
import math
import functools

import jax
import jax.numpy as jnp
from jax.experimental import pallas as pl
from jax.experimental.pallas import tpu as pltpu


# ----------------------------------------------------------------------------
# PE table construction (plain-JAX glue, matches the torch buffer exactly)
# ----------------------------------------------------------------------------
def build_pe_table(d_model: int, max_len: int = 5000) -> jnp.ndarray:
    position = jnp.arange(0.0, max_len, dtype=jnp.float32)[:, None]          # (max_len, 1)
    div_term = jnp.exp(
        jnp.arange(0.0, d_model, 2.0, dtype=jnp.float32)
        * (-(math.log(10000.0) / d_model))
    )                                                                         # (d_model//2,)
    sin = jnp.sin(position * div_term)                                        # (max_len, d/2)
    cos = jnp.cos(position * div_term)                                        # (max_len, d/2)
    pe = jnp.zeros((max_len, d_model), dtype=jnp.float32)
    pe = pe.at[:, 0::2].set(sin)
    pe = pe.at[:, 1::2].set(cos)
    return pe                                                                 # (max_len, d_model)


# ----------------------------------------------------------------------------
# Pallas kernels
# ----------------------------------------------------------------------------
def _pe_add_kernel(x_ref, pe_ref, o_ref):
    # x_ref: (1, TS, De), pe_ref: (TS, De) -> broadcast over the batch dim.
    o_ref[...] = x_ref[...] + pe_ref[...]


def _pe_add_dropout_kernel(x_ref, pe_ref, bits_ref, o_ref, *, threshold, scale):
    # bits_ref: (1, TS, De) uint32, iid uniform bits generated in the wrapper.
    # keep-prob has a <=2^-32 rounding bias from floor(rate*2^32); negligible.
    y = x_ref[...] + pe_ref[...]
    keep = bits_ref[...] >= jnp.uint32(threshold)
    # Single select: one VPU mul + vsel (no bool->float cast, no second mul).
    o_ref[...] = jnp.where(
        keep, y * jnp.asarray(scale, y.dtype), jnp.zeros((), y.dtype)
    ).astype(o_ref.dtype)


# ----------------------------------------------------------------------------
# Layout helpers
# ----------------------------------------------------------------------------
def _fold_factor(S: int, D: int) -> int:
    """Smallest k with (k*D) % 128 == 0 and S % k == 0 (lane-dense fold)."""
    if D % 128 == 0:
        return 1
    for k in range(2, 129):
        if (k * D) % 128 == 0 and S % k == 0:
            return k
    return 1


def _seq_tile(S_eff: int, D_eff: int, itemsize: int, target_bytes: int = 1 << 20) -> int:
    """~1 MiB sequence tiles, multiple of 8 sublanes (or the full seq if small)."""
    ts = max(8, (target_bytes // max(1, D_eff * itemsize)) // 8 * 8)
    return min(S_eff, ts)


# ----------------------------------------------------------------------------
# Wrapper
# ----------------------------------------------------------------------------
@functools.partial(jax.jit, static_argnames=("dropout", "training"))
def positional_encoding(x, pe_table, *, dropout: float = 0.1,
                        training: bool = False, rng=None):
    """x: (B, S, D); pe_table: (max_len, D) float32.  Matches the torch forward."""
    B, S, D = x.shape

    # nn.Dropout(p=1) zeroes everything; guard the 1/(1-p) scale explicitly.
    if training and dropout >= 1.0:
        return jnp.zeros_like(x)

    # Lane-dense fold: (B, S, D) -> (B, S/k, k*D) so the last dim is a multiple
    # of 128 (full-width vst).  Contiguous reshape => free (no data movement).
    k = _fold_factor(S, D)
    S_eff, D_eff = S // k, D * k
    x_f = x.reshape(B, S_eff, D_eff)
    pe_f = pe_table[:S].astype(x.dtype).reshape(S_eff, D_eff)

    itemsize = int(jnp.dtype(x.dtype).itemsize)
    ts = _seq_tile(S_eff, D_eff, itemsize)
    n_s = pl.cdiv(S_eff, ts)

    # Grid: (seq_tiles, batch) -- batch innermost so the PE tile (indexed only
    # by the seq tile) stays resident across all batch elements.
    x_spec = pl.BlockSpec((1, ts, D_eff), lambda s, b: (b, s, 0))
    pe_spec = pl.BlockSpec((ts, D_eff), lambda s, b: (s, 0))
    out_spec = pl.BlockSpec((1, ts, D_eff), lambda s, b: (b, s, 0))
    out_shape = jax.ShapeDtypeStruct((B, S_eff, D_eff), x.dtype)

    compiler_params = pltpu.CompilerParams(
        dimension_semantics=("parallel", "parallel"),
        # ~1 MiB tiles => <8 MiB live buffers; explicit limit keeps us well
        # inside v7x's 64 MiB physical VMEM (and v5e/v6e scoped defaults).
        vmem_limit_bytes=32 * 1024 * 1024,
    )

    if (not training) or dropout == 0.0:
        out = pl.pallas_call(
            _pe_add_kernel,
            out_shape=out_shape,
            grid_spec=pltpu.PrefetchScalarGridSpec(
                num_scalar_prefetch=0,
                grid=(n_s, B),
                in_specs=[x_spec, pe_spec],
                out_specs=out_spec,
            ),
            compiler_params=compiler_params,
            cost_estimate=pl.CostEstimate(
                flops=B * S * D,
                transcendentals=0,
                bytes_accessed=itemsize * (2 * B * S * D + S * D),
            ),
        )(x_f, pe_f)
        return out.reshape(B, S, D)

    # Training-mode dropout: uniform uint32 bits streamed in; thresholded in-kernel.
    if rng is None:
        rng = jax.random.PRNGKey(0)
    bits = jax.random.bits(rng, (B, S_eff, D_eff), dtype=jnp.uint32)
    threshold = min(int(float(dropout) * 4294967296.0), 4294967295)
    scale = 1.0 / (1.0 - float(dropout))
    bits_spec = pl.BlockSpec((1, ts, D_eff), lambda s, b: (b, s, 0))

    out = pl.pallas_call(
        functools.partial(_pe_add_dropout_kernel, threshold=threshold, scale=scale),
        out_shape=out_shape,
        grid_spec=pltpu.PrefetchScalarGridSpec(
            num_scalar_prefetch=0,
            grid=(n_s, B),
            in_specs=[x_spec, pe_spec, bits_spec],
            out_specs=out_spec,
        ),
        compiler_params=compiler_params,
        cost_estimate=pl.CostEstimate(
            flops=3 * B * S * D,
            transcendentals=0,
            bytes_accessed=itemsize * (2 * B * S * D + S * D) + 4 * B * S * D,
        ),
    )(x_f, pe_f, bits)
    return out.reshape(B, S, D)


# ----------------------------------------------------------------------------
# Demo / self-test
# ----------------------------------------------------------------------------
if __name__ == "__main__":
    key = jax.random.PRNGKey(0)
    B, S, D = 2, 8, 32            # batch, seq, d_model
    max_len = 64                  # small but > S
    dropout_p = 0.1

    x = jax.random.normal(key, (B, S, D), dtype=jnp.float32)
    pe_table = build_pe_table(D, max_len=max_len)
    ref = x + pe_table[None, :S, :]

    # Eval-mode forward (dropout is identity), matching module.eval() semantics.
    out = positional_encoding(x, pe_table, dropout=dropout_p, training=False)
    out = jax.block_until_ready(out)
    assert out.shape == (B, S, D)
    assert jnp.allclose(out, ref, atol=1e-6), "eval-mode mismatch vs reference"

    # Training-mode forward with dropout.  Mask bits come from jax.random, so
    # they cannot bitwise-match torch's RNG; semantics (keep-prob, 1/(1-p)
    # scaling, zeros for dropped) match nn.Dropout.
    out_tr = positional_encoding(x, pe_table, dropout=dropout_p, training=True,
                                 rng=jax.random.PRNGKey(123))
    out_tr = jax.block_until_ready(out_tr)
    assert out_tr.shape == (B, S, D)
    scaled = ref * (1.0 / (1.0 - dropout_p))
    is_zero = out_tr == 0.0
    is_scaled = jnp.abs(out_tr - scaled) <= 1e-5 * jnp.maximum(1.0, jnp.abs(scaled))
    assert bool(jnp.all(is_zero | is_scaled)), "dropout output not {0, scaled} valued"

    print("KERNEL_OK")
</pallas_src>

<mosaic_0001>
module attributes {stable_mosaic.version = 11 : i64} {
  func.func @_pe_add_kernel(%arg0: i32, %arg1: i32, %arg2: memref<1x2x128xf32, #tpu.memory_space<vmem>>, %arg3: memref<2x128xf32, #tpu.memory_space<vmem>>, %arg4: memref<1x2x128xf32, #tpu.memory_space<vmem>>) attributes {dimension_semantics = [#tpu.dimension_semantics<parallel>, #tpu.dimension_semantics<parallel>], iteration_bounds = array<i64: 1, 2>, scalar_prefetch = 0 : i64, scratch_operands = 0 : i64, tpu.core_type = #tpu.core_type<tc>, window_params = [{transform_indices = @transform_0, window_bounds = array<i64: 1, 2, 128>}, {transform_indices = @transform_1, window_bounds = array<i64: 2, 128>}, {transform_indices = @transform_2, window_bounds = array<i64: 1, 2, 128>}]} {
    %c0 = arith.constant 0 : index
    %c0_0 = arith.constant 0 : index
    %c0_1 = arith.constant 0 : index
    %0 = vector.load %arg2[%c0, %c0_0, %c0_1] : memref<1x2x128xf32, #tpu.memory_space<vmem>>, vector<1x2x128xf32>
    %c0_2 = arith.constant 0 : index
    %c0_3 = arith.constant 0 : index
    %1 = vector.load %arg3[%c0_2, %c0_3] : memref<2x128xf32, #tpu.memory_space<vmem>>, vector<2x128xf32>
    %2 = vector.shape_cast %1 : vector<2x128xf32> to vector<1x2x128xf32>
    %3 = arith.addf %0, %2 : vector<1x2x128xf32>
    %c0_4 = arith.constant 0 : index
    %c0_5 = arith.constant 0 : index
    %c0_6 = arith.constant 0 : index
    %4 = vector.load %arg4[%c0_4, %c0_5, %c0_6] : memref<1x2x128xf32, #tpu.memory_space<vmem>>, vector<1x2x128xf32>
    tpu.vector_store %arg4[%c0_4, %c0_5, %c0_6], %3 {strides = array<i32>} : memref<1x2x128xf32, #tpu.memory_space<vmem>>, vector<1x2x128xf32>,
    return
  }
  func.func @transform_0(%arg0: i32, %arg1: i32) -> (i32, i32, i32) {
    %c0_i32 = arith.constant 0 : i32
    %c0_i32_0 = arith.constant 0 : i32
    return %arg1, %arg0, %c0_i32 : i32, i32, i32
  }
  func.func @transform_1(%arg0: i32, %arg1: i32) -> (i32, i32) {
    %c0_i32 = arith.constant 0 : i32
    %c0_i32_0 = arith.constant 0 : i32
    return %arg0, %c0_i32 : i32, i32
  }
  func.func @transform_2(%arg0: i32, %arg1: i32) -> (i32, i32, i32) {
    %c0_i32 = arith.constant 0 : i32
    %c0_i32_0 = arith.constant 0 : i32
    return %arg1, %arg0, %c0_i32 : i32, i32, i32
  }
}

</mosaic_0001>

<bundles_post_ra>
// kernel: positional_encoding.1
= control target key start
LH: loop header
LB: loop body
LE: loop exit
PB: predicated region body
PF: predicated region fallthrough
CT: control target
= control target key end

     0   :  { %s354_s9 = smov 0   ;;  %s331_s10 = smov 0   ;;  %s368_s0 = inlined_call_operand.vmem [shape: f32[2,2,128], index: 0, kind: input, shape index: {}]   ;;  %s369_s1 = inlined_call_operand.vmem [shape: f32[2,128], index: 1, kind: input, shape index: {}]   ;;  %s370_s2 = inlined_call_operand.vmem [shape: f32[2,2,128], index: 2, kind: output, shape index: {}]  }
   0x1   :  { %s335_s11 = smov 0  }
   0x2 LB: > { %s21_s12 = sadd.s32 1, %s333_s10  ;;  %p286_p0 = scmp.ge.s32.totalorder %s337_s11, 1  ;;  %s337_s11 = sphi %s335_s11, %s12_s11   ;;  %s333_s10 = sphi %s331_s10, %s332_s10   ;;  %s329_s9 = sphi %s354_s9, %s371_s9  }
   0x3   : > { %p22_p1 = scmp.ge.s32.totalorder %s21_s12, 2  ;;  %p139_p2 = scmp.lt.s32.totalorder %s337_s11, 3 }
   0x5   : > { %s373_s12 = smov (%p22_p1, %s21_s12), 0  ;;  %p140_p3 = pnand %p286_p0, %p139_p2 }
   0x6   : > { %p169_p4 = scmp.lt.s32.totalorder (!%p140_p3), %s329_s9, 1 }
   0x7   : > { %143 = sbr.rel (%p140_p3) target bundleno = 19 (0x13), region = 28 }
   0xc   : > { %s375_s9 = smov (!%p169_p4, %s329_s9), 1  ;;  %v188_v0 = vld [vmem:[%s369_s1] sm:$0x3] }
   0xd   : > { %s287_s13 = sshll.u32 %s375_s9, 1 }
   0xe   : > { %s175_s18 = scalar_lea.vmem %s368_s0, %s287_s13  ;;  %s186_s21 = scalar_lea.vmem %s370_s2, %s287_s13 }
   0xf   : > { %v187_v1 = vld [vmem:[%s175_s18] sm:$0x3] }
  0x10   : > { %v189_v2 = vadd.f32 %v188_v0, %v187_v1 }
  0x12   : > { %190 = vst [vmem:[%s186_s21] sm:$0x3] %v189_v2 }
  0x13 PF: > { %s12_s11 = sadd.s32 1, %s337_s11   ;;  %s371_s9 = smov %s333_s10 }
  0x14   : > { %p9_p5 = scmp.ge.s32.totalorder %s12_s11, 4   ;;  %s332_s10 = smov %s373_s12  }
  0x16   :  { %11 = sbr.rel (!%p9_p5) target bundleno = 2 (0x2), region = 61 }

</bundles_post_ra>
